<compile_context>
chip_gen: v7x
topology: tpu7x:2x2x1
jax: 0.10.0
libtpu: 0.0.40
codegen_flags: <defaults>
</compile_context>

<pallas_src>
import functools

import jax
import jax.numpy as jnp
from jax.experimental import pallas as pl
from jax.experimental.pallas import tpu as pltpu


def _round_up(x, m):
    return ((x + m - 1) // m) * m


def _vmem_capacity_bytes():
    """Best-effort physical VMEM capacity; conservative default if unknown."""
    try:
        cap = int(getattr(pltpu.get_tpu_info(), "vmem_capacity_bytes", 0))
        if cap > 0:
            return cap
    except Exception:
        pass
    return 64 << 20   # smallest current per-TC VMEM (v7x)


def _num_tensorcores():
    """Best-effort TensorCore count per chip (v7x=2, v5e/v6e=1)."""
    try:
        info = pltpu.get_tpu_info()
    except Exception:
        return 1
    for attr in ("num_tensorcores", "tensorcores_per_chip", "num_cores",
                 "cores_per_chip", "core_count"):
        try:
            v = int(getattr(info, attr, 0))
        except Exception:
            v = 0
        if v >= 1:
            return v
    return 1


def _pick_tiles(n, g, lanes, itemsize, budget):
    """Pick (tile_n, lane_tile) maximizing the resident block under `budget`
    bytes of *physical* (sublane-padded, double-buffered) VMEM."""
    pack = max(8, 32 // max(1, itemsize))    # sublane packing: f32=8, bf16=16, i8=32

    lane_cands = [lanes]
    if lanes % 128 == 0:
        lane_cands = [d for d in range(128, lanes + 1, 128) if lanes % d == 0]

    # Batch-tile candidates: divide N and either equal N or be a multiple of 8
    # so the (tile_n, lane_tile) output block satisfies the (8,128) layout rule.
    n_cands = [t for t in range(1, n + 1) if n % t == 0 and (t == n or t % 8 == 0)]

    def footprint(tn, lt):
        lt_pad = _round_up(lt, 128)
        in_blk = tn * _round_up(g, pack) * lt_pad * itemsize
        out_blk = _round_up(tn, pack) * lt_pad * itemsize
        return 2 * (in_blk + out_blk)        # double-buffered in + out

    best = (min(n_cands), min(lane_cands))   # minimal-block fallback
    best_elems = 0
    for lt in sorted(lane_cands, reverse=True):
        for tn in sorted(n_cands, reverse=True):
            if footprint(tn, lt) <= budget:
                if tn * lt > best_elems:
                    best_elems = tn * lt
                    best = (tn, lt)
                break                         # largest feasible tn for this lt
    return best


def _squeeze_aggregate_kernel(x_ref, o_ref, *, scale, acc_dtype):
    # x_ref: (tile_n, G, lane_tile)   o_ref: (tile_n, lane_tile)
    acc = jnp.sum(x_ref[...], axis=1, dtype=acc_dtype)   # reduce groups (VPU)
    if scale != 1.0:                                      # 'mean' aggregate
        acc = acc * scale
    o_ref[...] = acc.astype(o_ref.dtype)


def squeeze_aggregate_forward(x, input_channels, output_channels,
                              aggregate="sum"):
    """Pallas TPU forward of SqueezeAggregateLayer."""
    N, C, H, W = x.shape
    if C != input_channels:
        raise ValueError(
            f"Input tensor has {C} channels, expected {input_channels}")
    if input_channels % output_channels != 0:
        raise ValueError("num_channels must be divisible by K")
    if aggregate not in ("sum", "mean"):
        raise ValueError(f"unknown aggregate: {aggregate}")
    floating = jnp.issubdtype(x.dtype, jnp.floating)
    if aggregate == "mean" and not floating:
        raise ValueError("aggregate='mean' requires a floating-point dtype")

    K = output_channels
    G = C // K
    HW = H * W
    L = K * HW
    # Pure view reshape: channel (g*K + k), pixel hw -> row g, lane k*HW + hw.
    x_flat = x.reshape(N, G, L)

    itemsize = jnp.dtype(x.dtype).itemsize
    cap = _vmem_capacity_bytes()
    budget = min(32 << 20, cap // 2)              # resident, double-buffered blocks
    vmem_limit = int(min(64 << 20, (cap * 3) // 4))

    tile_n, lane_tile = _pick_tiles(N, G, L, itemsize, budget)

    # Only shrink tiles for megacore when a second TensorCore actually exists.
    if _num_tensorcores() >= 2 and (N // tile_n) * (L // lane_tile) < 2:
        n_split = [t for t in range(1, N // 2 + 1) if N % t == 0 and t % 8 == 0]
        if n_split:
            tile_n = max(n_split)
        elif lane_tile % 256 == 0:
            lane_tile //= 2

    grid = (N // tile_n, L // lane_tile)
    acc_dtype = jnp.float32 if floating else jnp.int32
    scale = 1.0 if aggregate == "sum" else 1.0 / G
    kernel = functools.partial(_squeeze_aggregate_kernel,
                               scale=scale, acc_dtype=acc_dtype)

    out = pl.pallas_call(
        kernel,
        out_shape=jax.ShapeDtypeStruct((N, L), x.dtype),
        grid=grid,
        in_specs=[pl.BlockSpec((tile_n, G, lane_tile), lambda i, j: (i, 0, j))],
        out_specs=pl.BlockSpec((tile_n, lane_tile), lambda i, j: (i, j)),
        compiler_params=pltpu.CompilerParams(
            dimension_semantics=("parallel", "parallel"),
            vmem_limit_bytes=vmem_limit),
    )(x_flat)
    return out.reshape(N, K, H, W)


def _reference(x, output_channels, aggregate):
    N, C, H, W = x.shape
    xr = x.reshape(N, C // output_channels, output_channels, H, W)
    return xr.sum(axis=1) if aggregate == "sum" else xr.mean(axis=1)


if __name__ == "__main__":
    key = jax.random.PRNGKey(0)
    (k1,) = jax.random.split(key, 1)

    # SqueezeAggregateLayer(4, 2, 'sum') on x: (2, 4, 16, 16)
    B, C, H, W = 2, 4, 16, 16
    x = jax.random.uniform(k1, (B, C, H, W), jnp.float32)

    fwd_sum = jax.jit(functools.partial(
        squeeze_aggregate_forward, input_channels=C, output_channels=2,
        aggregate="sum"))
    y_sum = fwd_sum(x)
    jax.block_until_ready(y_sum)
    assert y_sum.shape == (B, 2, H, W)
    assert bool(jnp.allclose(y_sum, _reference(x, 2, "sum"), atol=1e-5))

    # SqueezeAggregateLayer(4, 1, 'mean')
    fwd_mean = jax.jit(functools.partial(
        squeeze_aggregate_forward, input_channels=C, output_channels=1,
        aggregate="mean"))
    y_mean = fwd_mean(x)
    jax.block_until_ready(y_mean)
    assert y_mean.shape == (B, 1, H, W)
    assert bool(jnp.allclose(y_mean, _reference(x, 1, "mean"), atol=1e-5))

    # K == C degenerate case (single group -> identity under 'sum').
    fwd_id = jax.jit(functools.partial(
        squeeze_aggregate_forward, input_channels=C, output_channels=C,
        aggregate="sum"))
    y_id = fwd_id(x)
    jax.block_until_ready(y_id)
    assert bool(jnp.allclose(y_id, x, atol=1e-6))

    print("KERNEL_OK")
</pallas_src>

<mosaic_0001>
module attributes {stable_mosaic.version = 11 : i64} {
  func.func @_squeeze_aggregate_kernel(%arg0: i32, %arg1: i32, %arg2: memref<2x2x512xf32, #tpu.memory_space<vmem>>, %arg3: memref<2x512xf32, #tpu.memory_space<vmem>>) attributes {dimension_semantics = [#tpu.dimension_semantics<parallel>, #tpu.dimension_semantics<parallel>], iteration_bounds = array<i64: 1, 1>, scalar_prefetch = 0 : i64, scratch_operands = 0 : i64, tpu.core_type = #tpu.core_type<tc>, window_params = [{transform_indices = @transform_0, window_bounds = array<i64: 2, 2, 512>}, {transform_indices = @transform_1, window_bounds = array<i64: 2, 512>}]} {
    %c0 = arith.constant 0 : index
    %c0_0 = arith.constant 0 : index
    %c0_1 = arith.constant 0 : index
    %0 = vector.load %arg2[%c0, %c0_0, %c0_1] : memref<2x2x512xf32, #tpu.memory_space<vmem>>, vector<2x2x512xf32>
    %cst = arith.constant dense<0.000000e+00> : vector<2x512xf32>
    %1 = vector.multi_reduction <add>, %0, %cst [1] : vector<2x2x512xf32> to vector<2x512xf32>
    %c0_2 = arith.constant 0 : index
    %c0_3 = arith.constant 0 : index
    %2 = vector.load %arg3[%c0_2, %c0_3] : memref<2x512xf32, #tpu.memory_space<vmem>>, vector<2x512xf32>
    tpu.vector_store %arg3[%c0_2, %c0_3], %1 {strides = array<i32>} : memref<2x512xf32, #tpu.memory_space<vmem>>, vector<2x512xf32>,
    return
  }
  func.func @transform_0(%arg0: i32, %arg1: i32) -> (i32, i32, i32) {
    %c0_i32 = arith.constant 0 : i32
    %c0_i32_0 = arith.constant 0 : i32
    return %arg0, %c0_i32, %arg1 : i32, i32, i32
  }
  func.func @transform_1(%arg0: i32, %arg1: i32) -> (i32, i32) {
    %c0_i32 = arith.constant 0 : i32
    return %arg0, %arg1 : i32, i32
  }
}

</mosaic_0001>

<bundles_post_ra>
// kernel: squeeze_aggregate_forward.1
= control target key start
LH: loop header
LB: loop body
LE: loop exit
PB: predicated region body
PF: predicated region fallthrough
CT: control target
= control target key end

     0   :  { %v16_v0 = vlaneseq  ;;  %v175_v3 = vmov 1983009808   ;;  %vm54_vm0 = vcmask 1041408   ;;  %vm158_vm1 = vcmask 1041409   ;;  %s213_s0 = inlined_call_operand.vmem [shape: f32[2,2,512], index: 0, kind: input, shape index: {}]   ;;  %s214_s1 = inlined_call_operand.vmem [shape: f32[2,512], index: 1, kind: output, shape index: {}]  }
   0x1   :  { %v8_v1 = vld [vmem:[%s213_s0] sm:$0xff]  ;;  %v9_v2 = vld [vmem:[%s213_s0 + $0x8] sm:$0xff]  ;;  %v14_v4 = vunpack.c.l.s4 %v175_v3  ;;  %vm160_vm2 = vcmask 1043459   ;;  %vm162_vm3 = vcmask 1045509   ;;  %vm164_vm4 = vcmask 1047559  }
   0x2   :  { %v17_v5 = vshrl.u32 %v16_v0, 7  ;;  %v12_v6 = vcombine.high %v8_v1, %v8_v1  ;;  %v29_v8 = vcombine.high %v9_v2, %v9_v2 }
   0x3   :  { %v15_v7 = vunpack.c.0.s8 %v14_v4 }
   0x5   :  { %v192_v9 = vsub.s32 %v15_v7, %v17_v5 }
   0x7   :  { %v19_v10 = vrot.slane %v8_v1, %v192_v9  ;;  %v26_v11 = vrot.slane %v12_v6, %v192_v9  ;;  %v36_v12 = vrot.slane %v9_v2, %v192_v9  ;;  %v43_v13 = vrot.slane %v29_v8, %v192_v9 }
   0x9   :  { %v27_v14 = vcombine.high %v19_v10, %v19_v10  ;;  %v28_v15 = vcombine.high %v26_v11, %v26_v11  ;;  %v44_v16 = vcombine.high %v36_v12, %v36_v12  ;;  %v45_v17 = vcombine.high %v43_v13, %v43_v13 }
   0xa   :  { %v55_v18 = vsel %vm54_vm0, %v19_v10, 0.0  ;;  %v69_v19 = vsel %vm54_vm0, %v26_v11, 0.0  ;;  %v83_v20 = vsel %vm54_vm0, %v36_v12, 0.0  ;;  %v97_v21 = vsel %vm54_vm0, %v43_v13, 0.0 }
   0xb   :  { %v56_v22 = vrot.slane %v55_v18, 4  ;;  %v62_v23 = vsel %vm54_vm0, %v27_v14, 0.0  ;;  %v70_v24 = vrot.slane %v69_v19, 4  ;;  %v76_v25 = vsel %vm54_vm0, %v28_v15, 0.0 }
   0xc   :  { %v63_v26 = vrot.slane %v62_v23, 4  ;;  %v77_v27 = vrot.slane %v76_v25, 4  ;;  %v84_v28 = vrot.slane %v83_v20, 4  ;;  %v90_v29 = vsel %vm54_vm0, %v44_v16, 0.0 }
   0xd   :  { %v57_v30 = vadd.f32 %v56_v22, %v55_v18  ;;  %v71_v31 = vadd.f32 %v70_v24, %v69_v19  ;;  %v91_v32 = vrot.slane %v90_v29, 4  ;;  %v98_v33 = vrot.slane %v97_v21, 4 }
   0xe   :  { %v64_v34 = vadd.f32 %v63_v26, %v62_v23  ;;  %v78_v35 = vadd.f32 %v77_v27, %v76_v25  ;;  %v85_v36 = vadd.f32 %v84_v28, %v83_v20  ;;  %v104_v37 = vsel %vm54_vm0, %v45_v17, 0.0 }
   0xf   :  { %v58_v38 = vrot.slane %v57_v30, 2  ;;  %v72_v39 = vrot.slane %v71_v31, 2  ;;  %v92_v40 = vadd.f32 %v91_v32, %v90_v29  ;;  %v99_v41 = vadd.f32 %v98_v33, %v97_v21 }
  0x10   :  { %v65_v42 = vrot.slane %v64_v34, 2  ;;  %v79_v43 = vrot.slane %v78_v35, 2  ;;  %v86_v44 = vrot.slane %v85_v36, 2  ;;  %v105_v45 = vrot.slane %v104_v37, 4 }
  0x11   :  { %v59_v46 = vadd.f32 %v58_v38, %v57_v30  ;;  %v73_v47 = vadd.f32 %v72_v39, %v71_v31  ;;  %v93_v48 = vrot.slane %v92_v40, 2  ;;  %v100_v49 = vrot.slane %v99_v41, 2 }
  0x12   :  { %v66_v50 = vadd.f32 %v65_v42, %v64_v34  ;;  %v80_v51 = vadd.f32 %v79_v43, %v78_v35  ;;  %v87_v52 = vadd.f32 %v86_v44, %v85_v36  ;;  %v106_v53 = vadd.f32 %v105_v45, %v104_v37 }
  0x13   :  { %v60_v54 = vrot.slane %v59_v46, 1  ;;  %v74_v55 = vrot.slane %v73_v47, 1  ;;  %v94_v56 = vadd.f32 %v93_v48, %v92_v40  ;;  %v101_v57 = vadd.f32 %v100_v49, %v99_v41 }
  0x14   :  { %v67_v58 = vrot.slane %v66_v50, 1  ;;  %v81_v59 = vrot.slane %v80_v51, 1  ;;  %v88_v60 = vrot.slane %v87_v52, 1  ;;  %v107_v61 = vrot.slane %v106_v53, 2 }
  0x15   :  { %v61_v62 = vadd.f32 %v60_v54, %v59_v46  ;;  %v75_v63 = vadd.f32 %v74_v55, %v73_v47  ;;  %v95_v0 = vrot.slane %v94_v56, 1  ;;  %v102_v1 = vrot.slane %v101_v57, 1 }
  0x16   :  { %v68_v2 = vadd.f32 %v67_v58, %v66_v50  ;;  %v82_v3 = vadd.f32 %v81_v59, %v80_v51  ;;  %v89_v4 = vadd.f32 %v88_v60, %v87_v52  ;;  %v108_v5 = vadd.f32 %v107_v61, %v106_v53 }
  0x17   :  { %v96_v6 = vadd.f32 %v95_v0, %v94_v56  ;;  %v103_v7 = vadd.f32 %v102_v1, %v101_v57 }
  0x18   :  { %v109_v8 = vrot.slane %v108_v5, 1  ;;  %v119_v10 = vcombine.low %v61_v62, %v68_v2  ;;  %v120_v11 = vcombine.low %v75_v63, %v82_v3 }
  0x19   :  { %v136_v12 = vcombine.low %v89_v4, %v96_v6 }
  0x1a   :  { %v110_v13 = vadd.f32 %v109_v8, %v108_v5  ;;  %v127_v14 = vrot.slane %v119_v10, %v192_v9  ;;  %v134_v15 = vrot.slane %v120_v11, %v192_v9 }
  0x1b   :  { %v144_v17 = vrot.slane %v136_v12, %v192_v9 }
  0x1c   :  { %v137_v16 = vcombine.low %v103_v7, %v110_v13  ;;  %v135_v19 = vcombine.low %v127_v14, %v134_v15 }
  0x1e   :  { %v151_v18 = vrot.slane %v137_v16, %v192_v9 }
  0x20   :  { %v152_v20 = vcombine.low %v144_v17, %v151_v18 }
  0x22   :  { %v157_v21 = vrot.slane %v152_v20, 7 }
  0x24   :  { %v159_v22 = vsel %vm158_vm1, %v157_v21, %v135_v19 }
  0x25   :  { %v161_v23 = vsel %vm160_vm2, %v157_v21, %v159_v22 }
  0x26   :  { %v163_v24 = vsel %vm162_vm3, %v157_v21, %v161_v23 }
  0x27   :  { %v165_v25 = vsel %vm164_vm4, %v157_v21, %v163_v24 }
  0x28   :  { %167 = vst [vmem:[%s214_s1] sm:$0xff] %v165_v25 }

</bundles_post_ra>
